<compile_context>
chip_gen: v7x
topology: tpu7x:2x2x1
jax: 0.10.0
libtpu: 0.0.40
codegen_flags: <defaults>
</compile_context>

<pallas_src>
import jax
import jax.numpy as jnp
from jax.experimental import pallas as pl
from jax.experimental.pallas import tpu as pltpu


def _log_kernel(p_ref, x_ref, o_ref):
    # p_ref: SMEM scalar (shape (1,), float32); x_ref/o_ref: VMEM tiles.
    x = x_ref[...].astype(jnp.float32)
    o_ref[...] = (p_ref[0] * jnp.log(x)).astype(o_ref.dtype)


def _pick_tile_rows(rows, requested):
    """Multiple of 8, capped at `rows`, preferring >=2 grid steps (v7x megacore)."""
    if rows <= 8:
        return rows                      # block == full array (allowed)
    tr = max(8, (min(requested, rows) // 8) * 8)
    if rows >= 16:
        half = -(-rows // 2)             # ceil(rows / 2)
        half = -(-half // 8) * 8         # round up to sublane multiple
        tr = min(tr, half)               # guarantee at least 2 grid steps
    return tr


def log_model_forward(x, log_param, *, tile_rows=4096):
    """x: (B, C, H, W) float32 (or bf16), log_param: scalar. Returns logParam*log(x)."""
    orig_shape = x.shape
    n = x.size
    lane = 128
    rows = -(-n // lane)                 # ceil(n / 128)
    pad = rows * lane - n

    x_flat = x.reshape(-1)
    if pad:
        # Single pad (one extra copy only on the rare non-multiple-of-128 path);
        # constant 1.0 keeps log() finite on the discarded tail.
        x_flat = jnp.pad(x_flat, (0, pad), constant_values=1.0)
    x2d = x_flat.reshape(rows, lane)

    tr = _pick_tile_rows(rows, tile_rows)
    grid = (-(-rows // tr),)             # partial edge block handled by Pallas

    p = jnp.asarray(log_param, dtype=jnp.float32).reshape(1)
    itemsize = jnp.dtype(x.dtype).itemsize

    out2d = pl.pallas_call(
        _log_kernel,
        out_shape=jax.ShapeDtypeStruct((rows, lane), x.dtype),
        grid_spec=pltpu.PrefetchScalarGridSpec(
            num_scalar_prefetch=0,
            grid=grid,
            in_specs=[
                pl.BlockSpec(memory_space=pltpu.SMEM),          # logParam scalar
                pl.BlockSpec((tr, lane), lambda i: (i, 0)),     # x tile
            ],
            out_specs=pl.BlockSpec((tr, lane), lambda i: (i, 0)),
        ),
        compiler_params=pltpu.CompilerParams(
            dimension_semantics=("parallel",)),
        cost_estimate=pl.CostEstimate(
            flops=n, transcendentals=n, bytes_accessed=2 * n * itemsize),
    )(p, x2d)

    if pad:
        return out2d.reshape(-1)[:n].reshape(orig_shape)
    # Common path: no padding was applied -> reshape is free metadata, no copy.
    return out2d.reshape(orig_shape)


if __name__ == "__main__":
    key = jax.random.PRNGKey(0)
    # Small NCHW input; strictly positive so log(x) is finite.
    B, C, H, W = 2, 4, 16, 16
    x = jax.random.uniform(key, (B, C, H, W), dtype=jnp.float32,
                           minval=0.1, maxval=2.0)

    # Deterministic parameter init, matching torch.nn.Parameter(torch.tensor(1.0))
    log_param = jnp.float32(1.0)

    out = log_model_forward(x, log_param)
    out = jax.block_until_ready(out)

    # Correctness check against plain JAX reference
    ref = log_param * jnp.log(x)
    assert out.shape == x.shape and out.dtype == x.dtype
    assert jnp.allclose(out, ref, atol=1e-6, rtol=1e-6)
    print("KERNEL_OK")
</pallas_src>

<mosaic_0001>
module attributes {stable_mosaic.version = 11 : i64} {
  func.func @_log_kernel(%arg0: i32, %arg1: memref<1xf32, #tpu.memory_space<smem>>, %arg2: memref<8x128xf32, #tpu.memory_space<vmem>>, %arg3: memref<8x128xf32, #tpu.memory_space<vmem>>) attributes {dimension_semantics = [#tpu.dimension_semantics<parallel>], iteration_bounds = array<i64: 2>, scalar_prefetch = 0 : i64, scratch_operands = 0 : i64, tpu.core_type = #tpu.core_type<tc>, window_params = [{transform_indices = @transform_0, window_bounds = array<i64: 1>}, {transform_indices = @transform_1, window_bounds = array<i64: 8, 128>}, {transform_indices = @transform_2, window_bounds = array<i64: 8, 128>}]} {
    %c0 = arith.constant 0 : index
    %c0_0 = arith.constant 0 : index
    %0 = vector.load %arg2[%c0, %c0_0] : memref<8x128xf32, #tpu.memory_space<vmem>>, vector<8x128xf32>
    %c0_1 = arith.constant 0 : index
    %1 = memref.load %arg1[%c0_1] : memref<1xf32, #tpu.memory_space<smem>>
    %2 = math.log %0 : vector<8x128xf32>
    %3 = vector.broadcast %1 : f32 to vector<8x128xf32>
    %4 = arith.mulf %3, %2 : vector<8x128xf32>
    %c0_2 = arith.constant 0 : index
    %c0_3 = arith.constant 0 : index
    %5 = vector.load %arg3[%c0_2, %c0_3] : memref<8x128xf32, #tpu.memory_space<vmem>>, vector<8x128xf32>
    tpu.vector_store %arg3[%c0_2, %c0_3], %4 {strides = array<i32>} : memref<8x128xf32, #tpu.memory_space<vmem>>, vector<8x128xf32>,
    return
  }
  func.func @transform_0(%arg0: i32) -> i32 {
    %c0_i32 = arith.constant 0 : i32
    %c0_i32_0 = arith.constant 0 : i32
    return %c0_i32 : i32
  }
  func.func @transform_1(%arg0: i32) -> (i32, i32) {
    %c0_i32 = arith.constant 0 : i32
    %c0_i32_0 = arith.constant 0 : i32
    return %arg0, %c0_i32 : i32, i32
  }
  func.func @transform_2(%arg0: i32) -> (i32, i32) {
    %c0_i32 = arith.constant 0 : i32
    %c0_i32_0 = arith.constant 0 : i32
    return %arg0, %c0_i32 : i32, i32
  }
}

</mosaic_0001>

<bundles_post_ra>
// kernel: tpu_custom_call.1
= control target key start
LH: loop header
LB: loop body
LE: loop exit
PB: predicated region body
PF: predicated region fallthrough
CT: control target
= control target key end

     0   :  { %s590_s0 = inlined_call_operand.<no memory space> [shape: f32[1], index: 0, kind: input, shape index: {}]   ;;  %s591_s1 = inlined_call_operand.hbm [shape: f32[16,128], index: 1, kind: input, shape index: {}]   ;;  %s592_s2 = inlined_call_operand.hbm [shape: f32[16,128], index: 2, kind: output, shape index: {}]  }
   0x1   :  { %7 = sst [smem:[#allocation2]] %s590_s0 }
   0x2   :  { %8 = vsyncpa [#allocation4], 0 }
   0x3   :  { %10 = vsyncpa [#allocation4 + $0x1], 0 }
   0x4   :  { %11 = vsyncpa [#allocation5], 0 }
   0x5   :  { %13 = vsyncpa [#allocation5 + $0x1], 0  ;;  %s429_s11 = smov 0   ;;  %s431_s12 = smov 0  }
   0x6   :  { %s433_s13 = smov 0   ;;  %s435_s14 = smov 0  }
   0x7 LB: > { %s450_s0 = sadd.s32 4294967295, %s407_s14   ;;  %s251_s15 = sadd.s32 4294967294, %s407_s14   ;;  %s407_s14 = sphi %s435_s14, %s607_s14   ;;  %s403_s13 = sphi %s433_s13, %s606_s13   ;;  %s399_s12 = sphi %s431_s12, %s605_s12   ;;  %s395_s11 = sphi %s429_s11, %s604_s11  }
   0x8   : > { %s454_s16 = sadd.s32 1, %s407_s14   ;;  %s47_s17 = sadd.s32 1, %s403_s13 }
   0x9   : > { %s44_s18 = ssub.s32 %s407_s14, %s454_s16  ;;  %p54_p0 = scmp.ne.s32.totalorder %s403_s13, %s399_s12 }
   0xa   : > { %p45_p1 = scmp.eq.s32.totalorder %s44_s18, 0  ;;  %p55_p2 = scmp.eq.s32.totalorder %s407_s14, 0 }
   0xb   : > { %p60_p3 = scmp.ne.s32.totalorder %s399_s12, %s395_s11  ;;  %p61_p4 = scmp.eq.s32.totalorder %s450_s0, 0 }
   0xc   : > { %s466_s19 = scalar_select %p45_p1, %s403_s13, %s47_s17  }
   0xd   : > { %p468_p5 = por %p55_p2, %p54_p0  ;;  %p472_p6 = por %p61_p4, %p60_p3 }
   0xe   : > { %p84_p7 = scmp.eq.s32.totalorder %s450_s0, 1  ;;  %p90_p8 = scmp.eq.s32.totalorder %s251_s15, 1 }
   0xf   : > { %p275_p10 = scmp.lt.s32.totalorder %s407_s14, 2  ;;  %s113_s24 = sand.u32 1, %s403_s13  }
  0x10   : > { %p479_p11 = por %p84_p7, %p54_p0  ;;  %p483_p12 = por %p90_p8, %p60_p3 }
  0x11   : > { %s255_s25 = sshll.u32 %s407_s14, 7  ;;  %s254_s26 = sshll.u32 %s113_s24, 3 }
  0x12   : > { %s596_s22 = scalar_select %p479_p11, 1, 0 }
  0x13   : > { %s597_s23 = scalar_select %p483_p12, 1, 0 }
  0x14   : > { %s492_s29 = scalar_lea.hbm %s591_s1, %s255_s25  ;;  %s117_s30 = scalar_lea.vmem [#allocation3], %s254_s26 }
  0x15   : > { %s124_s3 = sshll.u32 %s117_s30, 4  ;;  %p496_p13 = pnand %p275_p10, %p468_p5  ;;  %s500_s3 = int_to_ptr.vmem [resolvable:$true] %s124_s3 }
  0x16   : > { %s114_s5 = scalar_lea.sflag [#allocation4], %s113_s24  ;;  %s311_s6 = scalar_lea.hbm %s492_s29, 128 }
  0x17   : > { %p312_p2 = scmp.ne.s32.totalorder %s492_s29, %s311_s6  ;;  %p313_p3 = pneg %p496_p13 }
  0x18   : > { %s316_s9 = scalar_lea.hbm %s591_s1, 256  ;;  %p317_p5 = scmp.lt.u32.totalorder %s492_s29, %s591_s1 }
  0x19   : > { %p314_p4 = pnand %p313_p3, %p312_p2  ;;  %p318_p8 = scmp.lt.u32.totalorder %s316_s9, %s311_s6 }
  0x1a   : > { %p320_p9 = scmp.lt.u32.totalorder %s311_s6, %s492_s29 }
  0x1b   : > { %p315_p7 = pneg %p314_p4  ;;  %p319_p10 = por %p318_p8, %p317_p5 }
  0x1d   : > { %p321_p0 = por %p320_p9, %p319_p10 }
  0x1f   : > { %p322_p1 = pnand %p321_p0, %p315_p7 }
  0x21   : > { %325 = shalt.err (!%p322_p1)
}
  0x22   : > { %s326_s17 = scalar_lea.vmem %s500_s3, 128  ;;  %s409_s18 = smov [#allocation3]  }
  0x23   : > { %p327_p2 = scmp.ne.s32.totalorder %s500_s3, %s326_s17  ;;  %s331_s20 = sshll.u32 %s409_s18, 4  ;;  %s332_s20 = int_to_ptr.vmem [resolvable:$false] %s331_s20 }
  0x24   : > { %s333_s24 = scalar_lea.vmem %s332_s20, 256  ;;  %p334_p11 = scmp.lt.s32.totalorder %s500_s3, %s332_s20 }
  0x25   : > { %p329_p4 = pnand %p327_p2, %p313_p3  ;;  %p335_p5 = scmp.lt.s32.totalorder %s333_s24, %s326_s17 }
  0x27   : > { %p330_p12 = pneg %p329_p4  ;;  %p336_p8 = por %p335_p5, %p334_p11 }
  0x29   : > { %p337_p9 = pnand %p336_p8, %p330_p12 }
  0x2b   : > { %340 = shalt.err (!%p337_p9)
}
  0x2c   : > { %270 = dma.hbm_to_vmem [thread:$0]  (!%p496_p13), %s492_s29, 128, %s500_s3, %s114_s5  }
  0x2d   : > { %p599_p0 = scmp.lt.s32.totalorder %s407_s14, 3  ;;  %p600_p1 = scmp.ge.s32.totalorder %s407_s14, 1 }
  0x2f   : > { %p130_p3 = pnand %p600_p1, %p599_p0 }
  0x30   : > { %s534_s25 = sand.u32 (!%p130_p3), 1, %s399_s12  }
  0x31   : > { %133 = sbr.rel (%p130_p3) target bundleno = 87 (0x57), region = 28  ;;  %s257_s26 = sshll.u32 (!%p130_p3), %s534_s25, 3 }
  0x32   : > { %s136_s27 = scalar_lea.sflag (!%p130_p3), [#allocation4], %s534_s25  ;;  %s139_s28 = scalar_lea.vmem (!%p130_p3), [#allocation3], %s257_s26 }
  0x38   : > { %386 = dma.done.wait (%p472_p6), %s136_s27, 128  }
  0x39   : > { %388 = vsyncadd (%p472_p6), %s136_s27, 4294967168  ;;  %v160_v0 = vld [vmem:[%s139_s28] sm:$0xff]  ;;  %s161_s29 = sld [smem:[#allocation2]]  ;;  %s159_s30 = scalar_lea.vmem [#allocation6], %s257_s26 }
  0x3a   : > { %309 = vlog2.f32 %v160_v0  ;;  %s181_s3 = sshll.u32 %s159_s30, 4  ;;  %s260_s4 = sshll.u32 %s450_s0, 7  ;;  %s543_s3 = int_to_ptr.vmem [resolvable:$true] %s181_s3 }
  0x3b   : > { %s548_s21 = scalar_lea.hbm %s592_s2, %s260_s4  ;;  %s168_s7 = scalar_lea.sflag [#allocation5], %s534_s25 }
  0x3c   : > { %s341_s8 = scalar_lea.vmem %s543_s3, 128  ;;  %p601_p11 = scmp.ne.s32.totalorder %s596_s22, 0 }
  0x3d   : > { %p342_p6 = scmp.ne.s32.totalorder %s543_s3, %s341_s8  ;;  %s410_s0 = smov [#allocation6]  }
  0x3e   : > { %s345_s9 = sshll.u32 %s410_s0, 4  ;;  %s346_s9 = int_to_ptr.vmem [resolvable:$false] %s345_s9 }
  0x3f   : > { %v164_v2 = vstv %s161_s29  ;;  %p343_p12 = pnand %p342_p6, %p601_p11  ;;  %s347_s10 = scalar_lea.vmem %s346_s9, 256 }
  0x40   : > { %p348_p7 = scmp.lt.s32.totalorder %s543_s3, %s346_s9  ;;  %p349_p10 = scmp.lt.s32.totalorder %s347_s10, %s341_s8 }
  0x41   : > { %p344_p13 = pneg %p343_p12 }
  0x42   : > { %p350_p2 = por %p349_p10, %p348_p7 }
  0x44   : > { %v310_v1 = vpop.eup %309  ;;  %p351_p4 = pnand %p350_p2, %p344_p13 }
  0x45   : > { %v163_v3 = vmul.f32 0.6931472, %v310_v1 }
  0x47   : > { %v165_v4 = vmul.f32 %v164_v2, %v163_v3 }
  0x49   : > { %166 = vst [vmem:[%s159_s30] sm:$0xff] %v165_v4 }
  0x4a   : > { %354 = shalt.err (!%p351_p4)
}
  0x4b   : > { %s355_s15 = scalar_lea.hbm %s548_s21, 128  ;;  %s359_s20 = scalar_lea.hbm %s592_s2, 256 }
  0x4c   : > { %p356_p5 = scmp.ne.s32.totalorder %s548_s21, %s355_s15  ;;  %p360_p0 = scmp.lt.u32.totalorder %s548_s21, %s592_s2 }
  0x4d   : > { %p361_p1 = scmp.lt.u32.totalorder %s359_s20, %s355_s15  ;;  %p363_p6 = scmp.lt.u32.totalorder %s355_s15, %s548_s21 }
  0x4e   : > { %p357_p8 = pnand %p356_p5, %p601_p11 }
  0x4f   : > { %p362_p3 = por %p361_p1, %p360_p0 }
  0x50   : > { %p358_p9 = pneg %p357_p8 }
  0x51   : > { %p364_p12 = por %p363_p6, %p362_p3 }
  0x53   : > { %p365_p13 = pnand %p364_p12, %p358_p9 }
  0x55   : > { %368 = shalt.err (!%p365_p13)
}
  0x56   : > { %265 = dma.vmem_to_hbm [thread:$0]  (%p601_p11), %s543_s3, 128, %s548_s21, %s168_s7  }
  0x57 PF: > { %s193_s26 = sand.u32 1, %s395_s11   ;;  %p602_p7 = scmp.ne.s32.totalorder %s597_s23, 0 }
  0x58   : > { %p603_p10 = scmp.ge.s32.totalorder %s407_s14, 2  ;;  %s194_s27 = scalar_lea.sflag [#allocation5], %s193_s26 }
  0x5a   : > { %p272_p2 = pnand %p603_p10, %p602_p7 }
  0x5c   : > { %390 = dma.done.wait (!%p272_p2), %s194_s27, 128  }
  0x5d   : > { %392 = vsyncadd (!%p272_p2), %s194_s27, 4294967168  ;;  %p16_p4 = scmp.ge.s32.totalorder %s454_s16, 4   ;;  %s604_s11 = smov %s399_s12 }
  0x5e   : > { %s605_s12 = smov %s403_s13  ;;  %s606_s13 = smov %s466_s19 }
  0x5f   : > { %s607_s14 = smov %s454_s16  ;;  %18 = sbr.rel (!%p16_p4) target bundleno = 7 (0x7), region = 73 }
  0x66   :  { %199 = vsyncpa [#allocation4], 1 }
  0x67   :  { %201 = vsyncpa [#allocation4 + $0x1], 1 }
  0x68   :  { %202 = vsyncpa [#allocation5], 1 }
  0x69   :  { %204 = vsyncpa [#allocation5 + $0x1], 1 }

</bundles_post_ra>
